<compile_context>
chip_gen: v7x
topology: tpu7x:2x2x1
jax: 0.10.0
libtpu: 0.0.40
codegen_flags: <defaults>
</compile_context>

<pallas_src>
import jax
import jax.numpy as jnp
from jax.experimental import pallas as pl
from jax.experimental.pallas import tpu as pltpu


def _kl_loss_kernel(x_ref, y_ref, mask_ref, out_ref, acc_ref):
    i = pl.program_id(1)  # inner (reduction) axis over row tiles of this shard

    @pl.when(i == 0)
    def _():
        acc_ref[...] = jnp.zeros_like(acc_ref)

    # ----- x branch: only x_sh and log(sum(exp(x_sh))) are needed ------------
    x = x_ref[...].astype(jnp.float32)                                  # (TN, V)
    x_sh = x - jnp.max(x, axis=-1, keepdims=True)
    log_sx = jnp.log(jnp.sum(jnp.exp(x_sh), axis=-1, keepdims=True))    # (TN, 1)

    # ----- y branch -----------------------------------------------------------
    y = y_ref[...].astype(jnp.float32)                                  # (TN, V)
    y_sh = y - jnp.max(y, axis=-1, keepdims=True)
    e_y = jnp.exp(y_sh)
    s_y = jnp.sum(e_y, axis=-1, keepdims=True)                          # (TN, 1)

    # Algebraic KL rewrite (exact, because sum_j softmax(y)_j == 1):
    #   sum_j py_j * (log_py_j - log_px_j)
    #     = (1/s_y) * sum_j e_y_j * (y_sh_j - x_sh_j) - log(s_y) + log(s_x)
    # No log_px / log_py / py full-tile temporaries are ever materialized.
    cross = jnp.sum(e_y * (y_sh - x_sh), axis=-1, keepdims=True)        # (TN, 1)
    # Reciprocal only touches TN per-row scalars per tile (~1/V of the EUP exp
    # work) so exact vs approx is performance-neutral here; exact keeps the
    # kernel within 1e-5 of the f32 reference.
    kl_row = cross * pl.reciprocal(s_y, approx=False) - jnp.log(s_y) + log_sx

    # masked_fill semantics applied to the per-row sum via jnp.where (no
    # full-tile mask broadcast/multiply, no 0*inf NaN propagation).
    m = mask_ref[...]                                                   # (TN, 1)
    kl_row = jnp.where(m > 0.0, jnp.float32(0.0), kl_row)
    acc_ref[...] += kl_row

    @pl.when(i == pl.num_programs(1) - 1)
    def _():
        # Collapse this shard's partials once, broadcast over a lane-dense
        # (8, 128) output block; the wrapper reads element [8*s, 0] per shard.
        out_ref[...] = jnp.zeros_like(out_ref) + jnp.sum(acc_ref[...])


def _tpu_tiling_defaults():
    """(per-input block byte target, scoped VMEM limit) by TPU generation."""
    block_target = 2 << 20          # ~2 MiB: measured sweet spot for v5e/v6e
    vmem_limit = 48 << 20           # safe on every generation (v7x physical = 64 MiB)
    try:
        info = pltpu.get_tpu_info()
        vmem_cap = int(getattr(info, "vmem_capacity_bytes", 128 << 20))
    except Exception:
        return block_target, vmem_limit     # conservative fallback, works everywhere
    if vmem_cap <= (64 << 20):
        # v7x-class core: 3.2 TB/s HBM makes the ~0.35us grid-step overhead the
        # tax to amortize -> bigger blocks; keep scoped limit below physical.
        return 3 << 20, 48 << 20
    # v5e / v6e: 128 MiB VMEM, strictly HBM-bound -> ~2 MiB blocks, raise limit.
    return 2 << 20, 64 << 20


def kl_loss_pallas(x, y, mask, normalize_length=False):
    """x, y: (B, T, V) logits (any float dtype); mask: (B, T) bool (True = ignore)."""
    assert x.shape == y.shape, f"{x.shape} {y.shape}"
    B = x.shape[0]
    V = x.shape[-1]

    x2 = x.reshape(-1, V)                 # keep native dtype (bf16 in -> bf16 DMA)
    y2 = y.reshape(-1, V)
    N = x2.shape[0]
    m2 = mask.reshape(-1, 1).astype(jnp.float32)

    block_target, vmem_limit = _tpu_tiling_defaults()
    dtype_bytes = jnp.dtype(x2.dtype).itemsize

    # ---- tiling -------------------------------------------------------------
    num_shards = 2                        # leading "parallel" axis (megacore / v7x 2-TC)
    # Per-sublane-row VMEM footprint: 2 double-buffered inputs (x, y) in native
    # dtype + ~6 live (TN, V) f32 intermediates inside the kernel body.
    live_f32_tiles = 6
    per_row_bytes = 4 * V * dtype_bytes + live_f32_tiles * V * 4
    vmem_budget = (2 * vmem_limit) // 3   # keep estimated footprint well under limit
    tn_block = block_target // max(1, V * dtype_bytes)
    tn_vmem = vmem_budget // max(1, per_row_bytes)
    tn = min(tn_block, tn_vmem, 8192)
    tn = max(8, (tn // 8) * 8)
    # TODO(synk): for very large vocabularies (V >= ~64k) tn degenerates to 8 and
    # the (8, V) f32 intermediates alone can stress v7x's 64 MiB VMEM; a V-tiled
    # online-softmax variant (grid axis over vocab chunks) would be needed there.

    rows_per_shard = pl.cdiv(N, num_shards)
    tn = min(tn, max(8, pl.cdiv(rows_per_shard, 8) * 8))
    tiles_per_shard = pl.cdiv(rows_per_shard, tn)
    n_pad = num_shards * tiles_per_shard * tn

    if n_pad != N:
        pad = n_pad - N
        x2 = jnp.pad(x2, ((0, pad), (0, 0)))
        y2 = jnp.pad(y2, ((0, pad), (0, 0)))
        m2 = jnp.pad(m2, ((0, pad), (0, 0)), constant_values=1.0)  # padded = masked

    def row_map(s, i):
        return (s * tiles_per_shard + i, 0)

    out = pl.pallas_call(
        _kl_loss_kernel,
        out_shape=jax.ShapeDtypeStruct((num_shards * 8, 128), jnp.float32),
        grid_spec=pltpu.PrefetchScalarGridSpec(
            num_scalar_prefetch=0,
            grid=(num_shards, tiles_per_shard),
            in_specs=[
                pl.BlockSpec((tn, V), row_map),
                pl.BlockSpec((tn, V), row_map),
                pl.BlockSpec((tn, 1), row_map),
            ],
            out_specs=pl.BlockSpec((8, 128), lambda s, i: (s, 0)),
            scratch_shapes=[pltpu.VMEM((tn, 1), jnp.float32)],
        ),
        compiler_params=pltpu.CompilerParams(
            dimension_semantics=("parallel", "arbitrary"),
            vmem_limit_bytes=vmem_limit,
        ),
    )(x2, y2, m2)

    total = jnp.sum(out[::8, 0])          # one partial per shard, at [8*s, 0]

    # TODO(synk): normalize_length=True references an undefined `total` (token
    # count) in the original module; only the divide-by-batch path is implemented.
    denom = jnp.float32(B)
    return total / denom


def kl_loss_ref(x, y, mask):
    """Pure-JAX reference mirroring the PyTorch module."""
    B = x.shape[0]
    V = x.shape[-1]
    x2 = x.reshape(-1, V).astype(jnp.float32)
    y2 = y.reshape(-1, V).astype(jnp.float32)
    py = jax.nn.softmax(y2, axis=1)
    log_px = jax.nn.log_softmax(x2, axis=1)
    kl = py * (jnp.log(py) - log_px)
    kl = jnp.where(mask.reshape(-1, 1), 0.0, kl)
    return jnp.sum(kl) / B


if __name__ == "__main__":
    B, T, V = 2, 10, 32   # batch, seq, vocab (self.size); N=20 exercises padding
    key = jax.random.PRNGKey(0)
    kx, ky = jax.random.split(key, 2)

    x = jax.random.normal(kx, (B, T, V), dtype=jnp.float32)
    y = jax.random.normal(ky, (B, T, V), dtype=jnp.float32)
    # mask: True on padded positions (tail frames of each sequence)
    lengths = jnp.array([10, 6], dtype=jnp.int32)
    mask = jnp.arange(T)[None, :] >= lengths[:, None]    # (B, T) bool

    out = kl_loss_pallas(x, y, mask)
    out = jax.block_until_ready(out)

    ref = kl_loss_ref(x, y, mask)
    assert jnp.allclose(out, ref, rtol=1e-5, atol=1e-5), (out, ref)

    print("KERNEL_OK")
</pallas_src>

<mosaic_0001>
module attributes {stable_mosaic.version = 11 : i64} {
  func.func @_kl_loss_kernel(%arg0: i32, %arg1: i32, %arg2: memref<16x32xf32, #tpu.memory_space<vmem>>, %arg3: memref<16x32xf32, #tpu.memory_space<vmem>>, %arg4: memref<16x1xf32, #tpu.memory_space<vmem>>, %arg5: memref<8x128xf32, #tpu.memory_space<vmem>>, %arg6: memref<16x1xf32, #tpu.memory_space<vmem>>) attributes {dimension_semantics = [#tpu.dimension_semantics<parallel>, #tpu.dimension_semantics<arbitrary>], iteration_bounds = array<i64: 2, 1>, scalar_prefetch = 0 : i64, scratch_operands = 1 : i64, tpu.core_type = #tpu.core_type<tc>, window_params = [{transform_indices = @transform_0, window_bounds = array<i64: 16, 32>}, {transform_indices = @transform_1, window_bounds = array<i64: 16, 32>}, {transform_indices = @transform_2, window_bounds = array<i64: 16, 1>}, {transform_indices = @transform_3, window_bounds = array<i64: 8, 128>}]} {
    %c0_i32 = arith.constant 0 : i32
    %0 = arith.cmpi eq, %arg1, %c0_i32 : i32
    %1 = arith.extui %0 : i1 to i32
    %c0_i32_0 = arith.constant 0 : i32
    %2 = arith.cmpi ne, %1, %c0_i32_0 : i32
    scf.if %2 {
      %cst_18 = arith.constant 0.000000e+00 : f32
      %40 = vector.broadcast %cst_18 : f32 to vector<16x1xf32>
      %c0_19 = arith.constant 0 : index
      %c0_20 = arith.constant 0 : index
      %41 = vector.load %arg6[%c0_19, %c0_20] : memref<16x1xf32, #tpu.memory_space<vmem>>, vector<16x1xf32>
      tpu.vector_store %arg6[%c0_19, %c0_20], %40 {strides = array<i32>} : memref<16x1xf32, #tpu.memory_space<vmem>>, vector<16x1xf32>,
    } else {
    }
    %c0 = arith.constant 0 : index
    %c0_1 = arith.constant 0 : index
    %3 = vector.load %arg2[%c0, %c0_1] : memref<16x32xf32, #tpu.memory_space<vmem>>, vector<16x32xf32>
    %cst = arith.constant dense<0xFF800000> : vector<16xf32>
    %4 = vector.multi_reduction <maximumf>, %3, %cst [1] : vector<16x32xf32> to vector<16xf32>
    %5 = vector.shape_cast %4 : vector<16xf32> to vector<16x1xf32>
    %6 = vector.broadcast %5 : vector<16x1xf32> to vector<16x32xf32>
    %7 = arith.subf %3, %6 : vector<16x32xf32>
    %8 = math.exp %7 : vector<16x32xf32>
    %cst_2 = arith.constant dense<0.000000e+00> : vector<16xf32>
    %9 = vector.multi_reduction <add>, %8, %cst_2 [1] : vector<16x32xf32> to vector<16xf32>
    %10 = vector.shape_cast %9 : vector<16xf32> to vector<16x1xf32>
    %11 = math.log %10 : vector<16x1xf32>
    %c0_3 = arith.constant 0 : index
    %c0_4 = arith.constant 0 : index
    %12 = vector.load %arg3[%c0_3, %c0_4] : memref<16x32xf32, #tpu.memory_space<vmem>>, vector<16x32xf32>
    %cst_5 = arith.constant dense<0xFF800000> : vector<16xf32>
    %13 = vector.multi_reduction <maximumf>, %12, %cst_5 [1] : vector<16x32xf32> to vector<16xf32>
    %14 = vector.shape_cast %13 : vector<16xf32> to vector<16x1xf32>
    %15 = vector.broadcast %14 : vector<16x1xf32> to vector<16x32xf32>
    %16 = arith.subf %12, %15 : vector<16x32xf32>
    %17 = math.exp %16 : vector<16x32xf32>
    %cst_6 = arith.constant dense<0.000000e+00> : vector<16xf32>
    %18 = vector.multi_reduction <add>, %17, %cst_6 [1] : vector<16x32xf32> to vector<16xf32>
    %19 = vector.shape_cast %18 : vector<16xf32> to vector<16x1xf32>
    %20 = arith.subf %16, %7 : vector<16x32xf32>
    %21 = arith.mulf %17, %20 : vector<16x32xf32>
    %cst_7 = arith.constant dense<0.000000e+00> : vector<16xf32>
    %22 = vector.multi_reduction <add>, %21, %cst_7 [1] : vector<16x32xf32> to vector<16xf32>
    %23 = vector.shape_cast %22 : vector<16xf32> to vector<16x1xf32>
    %24 = tpu.reciprocal %19 : vector<16x1xf32> -> vector<16x1xf32>
    %25 = arith.mulf %23, %24 : vector<16x1xf32>
    %26 = math.log %19 : vector<16x1xf32>
    %27 = arith.subf %25, %26 : vector<16x1xf32>
    %28 = arith.addf %27, %11 : vector<16x1xf32>
    %c0_8 = arith.constant 0 : index
    %c0_9 = arith.constant 0 : index
    %29 = vector.load %arg4[%c0_8, %c0_9] : memref<16x1xf32, #tpu.memory_space<vmem>>, vector<16x1xf32>
    %cst_10 = arith.constant 0.000000e+00 : f32
    %30 = vector.broadcast %cst_10 : f32 to vector<16x1xf32>
    %31 = arith.cmpf ogt, %29, %30 : vector<16x1xf32>
    %cst_11 = arith.constant 0.000000e+00 : f32
    %32 = vector.broadcast %cst_11 : f32 to vector<16x1xf32>
    %33 = arith.select %31, %32, %28 : vector<16x1xi1>, vector<16x1xf32>
    %c0_12 = arith.constant 0 : index
    %c0_13 = arith.constant 0 : index
    %34 = vector.load %arg6[%c0_12, %c0_13] : memref<16x1xf32, #tpu.memory_space<vmem>>, vector<16x1xf32>
    %35 = arith.addf %34, %33 : vector<16x1xf32>
    %c0_14 = arith.constant 0 : index
    %c0_15 = arith.constant 0 : index
    %36 = vector.load %arg6[%c0_14, %c0_15] : memref<16x1xf32, #tpu.memory_space<vmem>>, vector<16x1xf32>
    tpu.vector_store %arg6[%c0_14, %c0_15], %35 {strides = array<i32>} : memref<16x1xf32, #tpu.memory_space<vmem>>, vector<16x1xf32>,
    %c0_i32_16 = arith.constant 0 : i32
    %37 = arith.cmpi eq, %arg1, %c0_i32_16 : i32
    %38 = arith.extui %37 : i1 to i32
    %c0_i32_17 = arith.constant 0 : i32
    %39 = arith.cmpi ne, %38, %c0_i32_17 : i32
    scf.if %39 {
      %cst_18 = arith.constant 0.000000e+00 : f32
      %40 = vector.broadcast %cst_18 : f32 to vector<8x128xf32>
      %c0_19 = arith.constant 0 : index
      %c0_20 = arith.constant 0 : index
      %41 = vector.load %arg6[%c0_19, %c0_20] : memref<16x1xf32, #tpu.memory_space<vmem>>, vector<16x1xf32>
      %42 = vector.shape_cast %41 : vector<16x1xf32> to vector<1x16x1xf32>
      %cst_21 = arith.constant dense<0.000000e+00> : vector<1xf32>
      %43 = vector.multi_reduction <add>, %42, %cst_21 [1, 2] : vector<1x16x1xf32> to vector<1xf32>
      %44 = vector.shape_cast %43 : vector<1xf32> to vector<1x1x1xf32>
      %45 = vector.extract %44[0, 0, 0] : f32 from vector<1x1x1xf32>
      %46 = vector.broadcast %45 : f32 to vector<8x128xf32>
      %47 = arith.addf %40, %46 : vector<8x128xf32>
      %c0_22 = arith.constant 0 : index
      %c0_23 = arith.constant 0 : index
      %48 = vector.load %arg5[%c0_22, %c0_23] : memref<8x128xf32, #tpu.memory_space<vmem>>, vector<8x128xf32>
      tpu.vector_store %arg5[%c0_22, %c0_23], %47 {strides = array<i32>} : memref<8x128xf32, #tpu.memory_space<vmem>>, vector<8x128xf32>,
    } else {
    }
    return
  }
  func.func @transform_0(%arg0: i32, %arg1: i32) -> (i32, i32) {
    %c1_i32 = arith.constant 1 : i32
    %0 = arith.muli %arg0, %c1_i32 : i32
    %1 = arith.addi %0, %arg1 : i32
    %c0_i32 = arith.constant 0 : i32
    %c0_i32_0 = arith.constant 0 : i32
    return %1, %c0_i32 : i32, i32
  }
  func.func @transform_1(%arg0: i32, %arg1: i32) -> (i32, i32) {
    %c1_i32 = arith.constant 1 : i32
    %0 = arith.muli %arg0, %c1_i32 : i32
    %1 = arith.addi %0, %arg1 : i32
    %c0_i32 = arith.constant 0 : i32
    %c0_i32_0 = arith.constant 0 : i32
    return %1, %c0_i32 : i32, i32
  }
  func.func @transform_2(%arg0: i32, %arg1: i32) -> (i32, i32) {
    %c1_i32 = arith.constant 1 : i32
    %0 = arith.muli %arg0, %c1_i32 : i32
    %1 = arith.addi %0, %arg1 : i32
    %c0_i32 = arith.constant 0 : i32
    %c0_i32_0 = arith.constant 0 : i32
    return %1, %c0_i32 : i32, i32
  }
  func.func @transform_3(%arg0: i32, %arg1: i32) -> (i32, i32) {
    %c0_i32 = arith.constant 0 : i32
    %c0_i32_0 = arith.constant 0 : i32
    return %arg0, %c0_i32 : i32, i32
  }
}

</mosaic_0001>

<bundles_post_ra>
// kernel: tpu_custom_call.1
= control target key start
LH: loop header
LB: loop body
LE: loop exit
PB: predicated region body
PF: predicated region fallthrough
CT: control target
= control target key end

     0   :  { %8 = vsyncpa [#allocation4], 0  ;;  %s937_s0 = inlined_call_operand.vmem [shape: f32[32,32], index: 0, kind: input, shape index: {}]   ;;  %s938_s1 = inlined_call_operand.hbm [shape: f32[32,32], index: 1, kind: input, shape index: {}]   ;;  %s939_s2 = inlined_call_operand.vmem [shape: f32[32,1], index: 2, kind: input, shape index: {}]   ;;  %s940_s3 = inlined_call_operand.hbm [shape: f32[16,128], index: 3, kind: output, shape index: {}]  }
   0x1   :  { %10 = vsyncpa [#allocation4 + $0x1], 0 }
   0x2   :  { %11 = vsyncpa [#allocation5], 0 }
   0x3   :  { %13 = vsyncpa [#allocation5 + $0x1], 0  ;;  %s733_s12 = smov 0   ;;  %s735_s13 = smov 0  }
   0x4   :  { %s737_s14 = smov 0   ;;  %s739_s15 = smov 0  }
   0x5   :  { %s741_s16 = smov 0   ;;  %s743_s17 = smov 0  }
   0x6 LB: > { %s488_s18 = sadd.s32 4294967295, %s706_s17   ;;  %s489_s19 = sadd.s32 4294967294, %s706_s17   ;;  %s706_s17 = sphi %s743_s17, %s19_s17   ;;  %s702_s16 = sphi %s741_s16, %s955_s16   ;;  %s698_s15 = sphi %s739_s15, %s954_s15   ;;  %s694_s14 = sphi %s737_s14, %s953_s14   ;;  %s690_s13 = sphi %s735_s13, %s952_s13   ;;  %s686_s12 = sphi %s733_s12, %s951_s12  }
   0x7   : > { %s31_s20 = sadd.s32 1, %s702_s16  ;;  %s68_s21 = sadd.s32 1, %s694_s14 }
   0x8   : > { %p33_p0 = scmp.ge.s32.totalorder %s31_s20, 2  ;;  %p75_p1 = scmp.ne.s32.totalorder %s694_s14, %s690_s13 }
   0x9   : > { %p76_p2 = scmp.eq.s32.totalorder %s706_s17, 0  ;;  %p81_p3 = scmp.ne.s32.totalorder %s690_s13, %s686_s12 }
   0xa   : > { %s957_s20 = smov (%p33_p0, %s31_s20), 0  ;;  %p82_p5 = scmp.eq.s32.totalorder %s488_s18, 0 }
   0xb   : > { %p774_p4 = por %p76_p2, %p75_p1  ;;  %s65_s23 = ssub.s32 %s702_s16, %s957_s20 }
   0xc   : > { %p133_p6 = scmp.eq.s32.totalorder %s488_s18, 1  ;;  %p66_p7 = scmp.eq.s32.totalorder %s65_s23, 0 }
   0xd   : > { %p780_p8 = por %p82_p5, %p81_p3  ;;  %p139_p10 = scmp.eq.s32.totalorder %s489_s19, 1 }
   0xe   : > { %p784_p9 = por %p133_p6, %p75_p1  ;;  %p521_p13 = scmp.lt.s32.totalorder %s706_s17, 2 }
   0xf   : > { %s789_s26 = scalar_select %p66_p7, %s694_s14, %s68_s21  }
  0x10   : > { %s944_s25 = scalar_select %p784_p9, 1, 0 }
  0x11   : > { %p791_p11 = por %p139_p10, %p81_p3  ;;  %s170_s28 = sand.u32 1, %s694_s14  }
  0x12   : > { %s492_s29 = sshll.u32 %s170_s28, 4  ;;  %s506_s30 = sshll.u32 %s702_s16, 8 }
  0x13   : > { %s945_s27 = scalar_select %p791_p11, 1, 0 }
  0x14   : > { %s802_s6 = scalar_lea.hbm %s938_s1, %s506_s30  ;;  %s174_s7 = scalar_lea.vmem [#allocation3], %s492_s29 }
  0x15   : > { %s182_s8 = sshll.u32 %s174_s7, 4  ;;  %p808_p0 = pnand %p521_p13, %p774_p4  ;;  %s804_s8 = int_to_ptr.vmem [resolvable:$true] %s182_s8 }
  0x16   : > { %s813_s10 = scalar_lea.sflag [#allocation4], %s170_s28  ;;  %s594_s11 = scalar_lea.hbm %s802_s6, 256 }
  0x17   : > { %p595_p2 = scmp.ne.s32.totalorder %s802_s6, %s594_s11  ;;  %p596_p3 = pneg %p808_p0 }
  0x18   : > { %s599_s21 = scalar_lea.hbm %s938_s1, 512  ;;  %p600_p4 = scmp.lt.u32.totalorder %s802_s6, %s938_s1 }
  0x19   : > { %p597_p5 = pnand %p596_p3, %p595_p2  ;;  %p601_p7 = scmp.lt.u32.totalorder %s599_s21, %s594_s11 }
  0x1a   : > { %p603_p13 = scmp.lt.u32.totalorder %s594_s11, %s802_s6 }
  0x1b   : > { %p598_p6 = pneg %p597_p5  ;;  %p602_p10 = por %p601_p7, %p600_p4 }
  0x1d   : > { %p604_p12 = por %p603_p13, %p602_p10 }
  0x1f   : > { %p605_p1 = pnand %p604_p12, %p598_p6 }
  0x21   : > { %608 = shalt.err (!%p605_p1)
}
  0x22   : > { %s609_s28 = scalar_lea.vmem %s804_s8, 256  ;;  %s708_s29 = smov [#allocation3]  }
  0x23   : > { %p610_p2 = scmp.ne.s32.totalorder %s804_s8, %s609_s28  ;;  %s614_s30 = sshll.u32 %s708_s29, 4  ;;  %s615_s30 = int_to_ptr.vmem [resolvable:$false] %s614_s30 }
  0x24   : > { %s616_s4 = scalar_lea.vmem %s615_s30, 512  ;;  %p617_p9 = scmp.lt.s32.totalorder %s804_s8, %s615_s30 }
  0x25   : > { %p612_p5 = pnand %p610_p2, %p596_p3  ;;  %p618_p4 = scmp.lt.s32.totalorder %s616_s4, %s609_s28 }
  0x27   : > { %p613_p11 = pneg %p612_p5  ;;  %p619_p7 = por %p618_p4, %p617_p9 }
  0x29   : > { %p620_p10 = pnand %p619_p7, %p613_p11 }
  0x2b   : > { %623 = shalt.err (!%p620_p10)
}
  0x2c   : > { %s709_s5 = smov 128   ;;  %s710_s7 = smov 8  }
  0x2d   : > { %516 = dma.hbm_to_vmem [thread:$0]  (!%p808_p0), %s802_s6, 256, %s804_s8, %s813_s10, %s709_s5, %s709_s5, %s710_s7  }
  0x2e   : > { %p201_p12 = scmp.lt.s32.totalorder %s706_s17, 3  ;;  %p947_p1 = scmp.ge.s32.totalorder %s706_s17, 1 }
  0x30   : > { %p202_p3 = pnand %p947_p1, %p201_p12 }
  0x31   : > { %s845_s11 = sand.u32 (!%p202_p3), 1, %s690_s13  }
  0x32   : > { %205 = sbr.rel (%p202_p3) target bundleno = 619 (0x26b), region = 32  ;;  %s496_s18 = sshll.u32 (!%p202_p3), %s845_s11, 4 }
  0x33   : > { %s208_s19 = scalar_lea.sflag (!%p202_p3), [#allocation4], %s845_s11  ;;  %s211_s21 = scalar_lea.vmem (!%p202_p3), [#allocation3], %s496_s18 }
  0x39   : > { %677 = dma.done.wait (%p780_p8), %s208_s19, 256  }
  0x3a   : > { %679 = vsyncadd (%p780_p8), %s208_s19, 4294967040  ;;  %s498_s6 = sshll.u32 %s698_s15, 1  ;;  %vm273_vm0 = vcmask 261120   ;;  %v296_v0 = vld [vmem:[%s211_s21] sm:$0xff]  ;;  %v297_v4 = vld [vmem:[%s211_s21 + $0x8] sm:$0xff]  ;;  %vm268_vm1 = vcmask 7168  }
  0x3b   : > { %p248_p9 = scmp.lt.s32.totalorder %s498_s6, 3  ;;  %v298_v2 = vsel %vm273_vm0, %v296_v0, -inf  ;;  %v301_v6 = vsel %vm273_vm0, %v297_v4, -inf  ;;  %v711_v34 = vmov 0.0   ;;  %s497_s29 = sshll.u32 %s845_s11, 3 }
  0x3c   : > { %299 = vmax.xlane.f32.xlu0 %v298_v2  ;;  %269 = vst.msk [vmem:[#allocation2] sm:$0xff] %vm268_vm1, %v711_v34  ;;  %270 = vst.msk [vmem:[#allocation2 + $0x8] sm:$0xff] %vm268_vm1, %v711_v34  ;;  %s245_s30 = scalar_lea.vmem [#allocation6], %s497_s29  ;;  %s503_s5 = sshll.u32 %s698_s15, 7 }
  0x3d   : > { %s959_s6 = smov (!%p248_p9, %s498_s6), 3  ;;  %s385_s4 = sshll.u32 %s245_s30, 4  ;;  %s885_s4 = int_to_ptr.vmem [resolvable:$true] %s385_s4 }
  0x3e   : > { %s499_s8 = sshll.u32 %s959_s6, 3  ;;  %s890_s21 = scalar_lea.hbm %s940_s3, %s503_s5 }
  0x3f   : > { %s251_s22 = scalar_lea.vmem %s937_s0, %s499_s8  ;;  %s261_s28 = scalar_lea.vmem %s939_s2, %s499_s8 }
  0x40   : > { %v271_v1 = vld [vmem:[%s251_s22] sm:$0xff]  ;;  %v272_v5 = vld [vmem:[%s251_s22 + $0x8] sm:$0xff]  ;;  %302 = vmax.xlane.f32.xlu0 %v301_v6  ;;  %s372_s6 = scalar_lea.sflag [#allocation5], %s845_s11  ;;  %s624_s8 = scalar_lea.vmem %s885_s4, 128 }
  0x41   : > { %v274_v3 = vsel %vm273_vm0, %v271_v1, -inf  ;;  %v277_v7 = vsel %vm273_vm0, %v272_v5, -inf  ;;  %v338_v44 = vld [vmem:[%s261_s28] sm:$0xff]  ;;  %v339_v52 = vld [vmem:[%s261_s28 + $0x8] sm:$0xff]  ;;  %p625_p8 = scmp.ne.s32.totalorder %s885_s4, %s624_s8  ;;  %p948_p11 = scmp.ne.s32.totalorder %s944_s25, 0 }
  0x42   : > { %275 = vmax.xlane.f32.xlu1 %v274_v3  ;;  %vm340_vm2 = vcmp.gt.f32.partialorder %v338_v44, 0.0  ;;  %vm341_vm3 = vcmp.gt.f32.partialorder %v339_v52, 0.0  ;;  %s712_s15 = smov [#allocation6]  }
  0x43   : > { %v344_v54 = vld [vmem:[#allocation2] sm:$0xff]  ;;  %v345_v62 = vld [vmem:[#allocation2 + $0x8] sm:$0xff]  ;;  %p626_p0 = pnand %p625_p8, %p948_p11  ;;  %s628_s9 = sshll.u32 %s712_s15, 4  ;;  %s629_s9 = int_to_ptr.vmem [resolvable:$false] %s628_s9 }
  0x44   : > { %s630_s10 = scalar_lea.vmem %s629_s9, 256  ;;  %p631_p13 = scmp.lt.s32.totalorder %s885_s4, %s629_s9 }
  0x45   : > { %p627_p6 = pneg %p626_p0  ;;  %p632_p2 = scmp.lt.s32.totalorder %s630_s10, %s624_s8 }
  0x46   : > { %278 = vmax.xlane.f32.xlu1 %v277_v7 }
  0x47   : > { %p633_p5 = por %p632_p2, %p631_p13 }
  0x49   : > { %p634_p4 = pnand %p633_p5, %p627_p6 }
  0xc9   : > { %v300_v8 = vpop.xlane.xlu0 %299 }
  0xca   : > { %v304_v10 = vsub.f32 %v296_v0, %v300_v8 }
  0xcc   : > { %v306_v12 = vmul.f32 1.442695, %v304_v10 }
  0xcd   : > { %v303_v14 = vpop.xlane.xlu0 %302 }
  0xce   : > { %574 = vpow2.f32 %v306_v12  ;;  %v305_v16 = vsub.f32 %v297_v4, %v303_v14 }
  0xcf   : > { %v276_v9 = vpop.xlane.xlu1 %275 }
  0xd0   : > { %v280_v11 = vsub.f32 %v271_v1, %v276_v9  ;;  %v308_v18 = vmul.f32 1.442695, %v305_v16 }
  0xd2   : > { %v282_v13 = vmul.f32 1.442695, %v280_v11  ;;  %v316_v23 = vsub.f32 %v304_v10, %v280_v11 }
  0xd3   : > { %v279_v15 = vpop.xlane.xlu1 %278 }
  0xd4   : > { %v281_v17 = vsub.f32 %v272_v5, %v279_v15  ;;  %576 = vpow2.f32 %v282_v13 }
  0xd5   : > { %578 = vpow2.f32 %v308_v18 }
  0xd6   : > { %v284_v19 = vmul.f32 1.442695, %v281_v17  ;;  %v317_v29 = vsub.f32 %v305_v16, %v281_v17 }
  0xd8   : > { %580 = vpow2.f32 %v284_v19  ;;  %v575_v20 = vpop.eup %574 }
  0xd9   : > { %v310_v22 = vsel %vm273_vm0, %v575_v20, 0.0  ;;  %v318_v28 = vmul.f32 %v575_v20, %v316_v23 }
  0xda   : > { %311 = vadd.xlane.f32.xlu0 %v310_v22 }
  0xdb   : > { %v320_v31 = vsel %vm273_vm0, %v318_v28, 0.0 }
  0xde   : > { %v577_v21 = vpop.eup %576 }
  0xdf   : > { %v286_v24 = vsel %vm273_vm0, %v577_v21, 0.0  ;;  %v579_v25 = vpop.eup %578 }
  0xe0   : > { %v313_v27 = vsel %vm273_vm0, %v579_v25, 0.0  ;;  %287 = vadd.xlane.f32.xlu0 %v286_v24  ;;  %v319_v32 = vmul.f32 %v579_v25, %v317_v29 }
  0xe1   : > { %314 = vadd.xlane.f32.xlu1 %v313_v27 }
  0xe2   : > { %v581_v26 = vpop.eup %580  ;;  %v323_v33 = vsel %vm273_vm0, %v319_v32, 0.0 }
  0xe3   : > { %v289_v30 = vsel %vm273_vm0, %v581_v26, 0.0 }
  0xe4   : > { %321 = vadd.xlane.f32.xlu0 %v320_v31 }
  0xe5   : > { %290 = vadd.xlane.f32.xlu1 %v289_v30 }
  0xe9   : > { %324 = vadd.xlane.f32.xlu1 %v323_v33 }
 0x167   : > { %v312_v35 = vpop.xlane.xlu0 %311 }
 0x168   : > { %582 = vrcp.f32 %v312_v35 }
 0x169   : > { %584 = vlog2.f32 %v312_v35 }
 0x16d   : > { %v288_v36 = vpop.xlane.xlu0 %287 }
 0x16e   : > { %v315_v37 = vpop.xlane.xlu1 %314  ;;  %586 = vlog2.f32 %v288_v36 }
 0x16f   : > { %588 = vrcp.f32 %v315_v37 }
 0x170   : > { %590 = vlog2.f32 %v315_v37 }
 0x171   : > { %v322_v40 = vpop.xlane.xlu0 %321 }
 0x172   : > { %v291_v38 = vpop.xlane.xlu1 %290  ;;  %v583_v39 = vpop.eup %582 }
 0x173   : > { %592 = vlog2.f32 %v291_v38  ;;  %v585_v41 = vpop.eup %584  ;;  %v328_v42 = vmul.f32 %v583_v39, %v322_v40 }
 0x174   : > { %v331_v43 = vmul.f32 0.6931472, %v585_v41 }
 0x176   : > { %v334_v48 = vsub.f32 %v328_v42, %v331_v43  ;;  %v325_v49 = vpop.xlane.xlu1 %324 }
 0x178   : > { %v587_v45 = vpop.eup %586 }
 0x179   : > { %v589_v46 = vpop.eup %588  ;;  %v293_v47 = vmul.f32 0.6931472, %v587_v45 }
 0x17a   : > { %v591_v50 = vpop.eup %590  ;;  %v329_v51 = vmul.f32 %v589_v46, %v325_v49 }
 0x17b   : > { %v336_v53 = vadd.f32 %v334_v48, %v293_v47  ;;  %v333_v55 = vmul.f32 0.6931472, %v591_v50 }
 0x17d   : > { %v593_v56 = vpop.eup %592  ;;  %v342_v57 = vsel %vm340_vm2, 0.0, %v336_v53  ;;  %v335_v59 = vsub.f32 %v329_v51, %v333_v55 }
 0x17e   : > { %v295_v58 = vmul.f32 0.6931472, %v593_v56  ;;  %v346_v60 = vadd.f32 %v344_v54, %v342_v57 }
 0x180   : > { %v337_v61 = vadd.f32 %v335_v59, %v295_v58  ;;  %349 = vst.msk [vmem:[#allocation2] sm:$0xff] %vm268_vm1, %v346_v60 }
 0x182   : > { %v343_v63 = vsel %vm341_vm3, 0.0, %v337_v61 }
 0x183   : > { %v347_v0 = vadd.f32 %v345_v62, %v343_v63 }
 0x185   : > { %350 = vst.msk [vmem:[#allocation2 + $0x8] sm:$0xff] %vm268_vm1, %v347_v0 }
 0x187   : > { %v354_v1 = vld [vmem:[#allocation2] sm:$0xff] }
 0x188   : > { %v356_v3 = vsel %vm268_vm1, %v354_v1, 0.0 }
 0x18c   : > { %v355_v2 = vld [vmem:[#allocation2 + $0x8] sm:$0xff] }
 0x18d   : > { %v357_v4 = vsel %vm268_vm1, %v355_v2, 0.0 }
 0x18e   : > { %v358_v5 = vadd.f32 %v357_v4, %v356_v3 }
 0x190   : > { %359 = vadd.xlane.f32.xlu0 %v358_v5 }
 0x21d   : > { %v360_v6 = vpop.xlane.xlu0 %359 }
 0x21e   : > { %v361_v7 = vrot.slane %v360_v6, 4 }
 0x220   : > { %v362_v8 = vadd.f32 %v361_v7, %v360_v6 }
 0x222   : > { %v363_v9 = vrot.slane %v362_v8, 2 }
 0x224   : > { %v364_v10 = vadd.f32 %v363_v9, %v362_v8 }
 0x226   : > { %v365_v11 = vrot.slane %v364_v10, 1 }
 0x228   : > { %v366_v12 = vadd.f32 %v365_v11, %v364_v10 }
 0x22a   : > { %507 = vpush %v366_v12 }
 0x25b   : > { %s508_s7 = spop %507 }
 0x25c   : > { %v368_v13 = vstv %s508_s7 }
 0x25d   : > { %370 = vst [vmem:[%s245_s30] sm:$0xff] %v368_v13 }
 0x25e   : > { %637 = shalt.err (!%p634_p4)
}
 0x25f   : > { %s638_s11 = scalar_lea.hbm %s890_s21, 128  ;;  %s642_s23 = scalar_lea.hbm %s940_s3, 256 }
 0x260   : > { %p639_p7 = scmp.ne.s32.totalorder %s890_s21, %s638_s11  ;;  %p643_p1 = scmp.lt.u32.totalorder %s890_s21, %s940_s3 }
 0x261   : > { %p644_p3 = scmp.lt.u32.totalorder %s642_s23, %s638_s11  ;;  %p646_p8 = scmp.lt.u32.totalorder %s638_s11, %s890_s21 }
 0x262   : > { %p640_p10 = pnand %p639_p7, %p948_p11 }
 0x263   : > { %p645_p9 = por %p644_p3, %p643_p1 }
 0x264   : > { %p641_p12 = pneg %p640_p10 }
 0x265   : > { %p647_p0 = por %p646_p8, %p645_p9 }
 0x267   : > { %p648_p6 = pnand %p647_p0, %p641_p12 }
 0x269   : > { %651 = shalt.err (!%p648_p6)
}
 0x26a   : > { %511 = dma.vmem_to_hbm [thread:$0]  (%p948_p11), %s885_s4, 128, %s890_s21, %s372_s6  }
 0x26b PF: > { %s397_s30 = sand.u32 1, %s686_s12   ;;  %p949_p13 = scmp.ne.s32.totalorder %s945_s27, 0 }
 0x26c   : > { %p950_p2 = scmp.ge.s32.totalorder %s706_s17, 2  ;;  %s398_s5 = scalar_lea.sflag [#allocation5], %s397_s30 }
 0x26e   : > { %p518_p5 = pnand %p950_p2, %p949_p13 }
 0x270   : > { %681 = dma.done.wait (!%p518_p5), %s398_s5, 128  }
 0x271   : > { %683 = vsyncadd (!%p518_p5), %s398_s5, 4294967168  ;;  %s19_s17 = sadd.s32 1, %s706_s17   ;;  %s951_s12 = smov %s690_s13 }
 0x272   : > { %p16_p4 = scmp.ge.s32.totalorder %s19_s17, 4   ;;  %s952_s13 = smov %s694_s14 }
 0x273   : > { %s953_s14 = smov %s789_s26  ;;  %s954_s15 = smov %s702_s16 }
 0x274   : > { %s955_s16 = smov %s957_s20  ;;  %18 = sbr.rel (!%p16_p4) target bundleno = 6 (0x6), region = 91 }
 0x27b   :  { %403 = vsyncpa [#allocation4], 1 }
 0x27c   :  { %405 = vsyncpa [#allocation4 + $0x1], 1 }
 0x27d   :  { %406 = vsyncpa [#allocation5], 1 }
 0x27e   :  { %408 = vsyncpa [#allocation5 + $0x1], 1 }

</bundles_post_ra>
